<compile_context>
chip_gen: v7x
topology: tpu7x:2x2x1
jax: 0.10.0
libtpu: 0.0.40
codegen_flags: <defaults>
</compile_context>

<pallas_src>
import jax
import jax.numpy as jnp
from jax import lax
from jax.experimental import pallas as pl
from jax.experimental.pallas import tpu as pltpu


def _scale_mul_kernel(scale_ref, re_ref, im_ref, ore_ref, oim_ref):
    # scale_ref: (TM, 1) f32;  data refs: (TM, TL) f32.  Broadcast over lanes.
    s = scale_ref[...]
    ore_ref[...] = re_ref[...] * s
    oim_ref[...] = im_ref[...] * s


def _round_up(x, m):
    return (x + m - 1) // m * m


_TL_MAX = 8192  # max lane tile (multiple of 128); 32 KiB per f32 row


def _chip_budgets():
    """(per-data-block byte budget, vmem_limit_bytes), per TPU generation.

    Each grid step holds 2 input + 2 output blocks, double-buffered (~8x one
    data block), so:
      v5e/v6e (128 MiB VMEM per core): 8 MiB blocks, 96 MiB scoped limit
      v7x     ( 64 MiB VMEM per core): 4 MiB blocks, 48 MiB scoped limit
    Falls back to the conservative (v7x-safe) pair if the hardware query is
    unavailable (e.g. interpret mode off-TPU).
    """
    try:
        vmem_bytes = pltpu.get_tpu_info().vmem_capacity_bytes
    except Exception:
        vmem_bytes = 64 << 20
    if vmem_bytes >= (96 << 20):
        return 8 << 20, 96 << 20
    return 4 << 20, 48 << 20


def _pick_row_tile(nc_pad, tl, block_budget):
    """Row tile: multiple of 8, divides nc_pad, block <= block_budget bytes,
    and leaves >= 2 row blocks when possible (v7x dual-TensorCore sharding)."""
    tm = max(8, (block_budget // (tl * 4)) // 8 * 8)
    tm = min(nc_pad, tm)
    if nc_pad >= 16 and tm > nc_pad // 2:
        tm = max(8, (nc_pad // 2) // 8 * 8)
    while nc_pad % tm != 0:
        tm -= 8
    return tm


def complex_dropout2d(x, key, p=0.5, training=True):
    """Pallas implementation of ComplexDropout2d.forward.

    x   : complex64, shape (N, C, H, W)   # NCHW, PyTorch convention
    key : jax PRNG key used to draw the per-(n, c) channel keep/drop decision
    """
    if (not training) or p == 0.0:
        return x
    if p >= 1.0:
        # Guard: reference produces NaN at p == 1 (0 * inf); all channels dropped.
        return jnp.zeros_like(x)

    N, C, H, W = x.shape
    NC, HW = N * C, H * W

    # Per-channel scale (tiny NC-length op in plain JAX).  Kept channels get
    # 1/(1-p)**2 -- faithful reproduction of complexPyTorch's double scaling.
    inv = 1.0 / (1.0 - p)
    u = jax.random.uniform(key, (NC,), dtype=jnp.float32)
    scale = jnp.where(u >= p, jnp.float32(inv * inv), jnp.float32(0.0)).reshape(NC, 1)

    # Split complex64 into two contiguous f32 planes (Mosaic has no complex dtype).
    x_re = jnp.real(x).reshape(NC, HW).astype(jnp.float32)
    x_im = jnp.imag(x).reshape(NC, HW).astype(jnp.float32)

    block_budget, vmem_limit = _chip_budgets()

    # Lane tile: multiple of 128 (unmasked stores), capped; pad lanes to a
    # multiple of the tile and rows to a multiple of 8 so the grid tiles evenly.
    tl = min(_round_up(HW, 128), _TL_MAX)
    hw_pad = _round_up(HW, tl)
    nc_pad = _round_up(NC, 8)
    if (nc_pad, hw_pad) != (NC, HW):
        pad = ((0, nc_pad - NC), (0, hw_pad - HW))
        x_re = jnp.pad(x_re, pad)
        x_im = jnp.pad(x_im, pad)
        scale = jnp.pad(scale, ((0, nc_pad - NC), (0, 0)))

    tm = _pick_row_tile(nc_pad, tl, block_budget)
    grid = (nc_pad // tm, hw_pad // tl)  # rows outer, lanes inner

    data_spec = pl.BlockSpec((tm, tl), lambda i, j: (i, j))
    grid_spec = pl.GridSpec(
        grid=grid,
        in_specs=[
            pl.BlockSpec((tm, 1), lambda i, j: (i, 0)),  # scale resident across lane steps
            data_spec,   # real plane
            data_spec,   # imag plane
        ],
        out_specs=[data_spec, data_spec],
    )

    o_re, o_im = pl.pallas_call(
        _scale_mul_kernel,
        out_shape=(jax.ShapeDtypeStruct((nc_pad, hw_pad), jnp.float32),
                   jax.ShapeDtypeStruct((nc_pad, hw_pad), jnp.float32)),
        grid_spec=grid_spec,
        input_output_aliases={1: 0, 2: 1},  # reuse the f32 plane buffers for outputs
        compiler_params=pltpu.CompilerParams(
            dimension_semantics=("parallel", "parallel"),  # no cross-step deps
            vmem_limit_bytes=vmem_limit,
        ),
    )(scale, x_re, x_im)

    o_re = o_re[:NC, :HW].reshape(N, C, H, W)
    o_im = o_im[:NC, :HW].reshape(N, C, H, W)
    return lax.complex(o_re, o_im).astype(x.dtype)


if __name__ == "__main__":
    key = jax.random.PRNGKey(0)
    k_re, k_im, k_drop = jax.random.split(key, 3)

    N, C, H, W = 2, 4, 16, 16
    p = 0.5

    x_re = jax.random.normal(k_re, (N, C, H, W), dtype=jnp.float32)
    x_im = jax.random.normal(k_im, (N, C, H, W), dtype=jnp.float32)
    x = (x_re + 1j * x_im).astype(jnp.complex64)

    y = jax.block_until_ready(complex_dropout2d(x, k_drop, p=p, training=True))

    # Pure-JAX reference (same per-channel RNG draws as the wrapper).
    u = jax.random.uniform(k_drop, (N * C,), dtype=jnp.float32)
    scale = jnp.where(u >= p, (1.0 / (1.0 - p)) ** 2, 0.0).reshape(N, C, 1, 1)
    ref = (x * scale).astype(jnp.complex64)
    assert jnp.allclose(y, ref, atol=1e-6), "mismatch vs reference"

    # Eval mode is the identity.
    y_eval = complex_dropout2d(x, k_drop, p=p, training=False)
    assert jnp.array_equal(y_eval, x)

    # Padded path: N*C % 8 != 0 and H*W % 128 != 0 exercise row/lane padding.
    N2, C2, H2, W2 = 2, 3, 5, 7
    x2 = (jax.random.normal(k_re, (N2, C2, H2, W2), dtype=jnp.float32)
          + 1j * jax.random.normal(k_im, (N2, C2, H2, W2), dtype=jnp.float32)
          ).astype(jnp.complex64)
    y2 = jax.block_until_ready(complex_dropout2d(x2, k_drop, p=p, training=True))
    u2 = jax.random.uniform(k_drop, (N2 * C2,), dtype=jnp.float32)
    scale2 = jnp.where(u2 >= p, (1.0 / (1.0 - p)) ** 2, 0.0).reshape(N2, C2, 1, 1)
    ref2 = (x2 * scale2).astype(jnp.complex64)
    assert jnp.allclose(y2, ref2, atol=1e-6), "mismatch vs reference (padded path)"

    print("KERNEL_OK")
</pallas_src>

<mosaic_0001>
module attributes {stable_mosaic.version = 11 : i64} {
  func.func @_scale_mul_kernel(%arg0: i32, %arg1: i32, %arg2: memref<8x1xf32, #tpu.memory_space<vmem>>, %arg3: memref<8x256xf32, #tpu.memory_space<vmem>>, %arg4: memref<8x256xf32, #tpu.memory_space<vmem>>, %arg5: memref<8x256xf32, #tpu.memory_space<vmem>>, %arg6: memref<8x256xf32, #tpu.memory_space<vmem>>) attributes {dimension_semantics = [#tpu.dimension_semantics<parallel>, #tpu.dimension_semantics<parallel>], iteration_bounds = array<i64: 1, 1>, scalar_prefetch = 0 : i64, scratch_operands = 0 : i64, tpu.core_type = #tpu.core_type<tc>, window_params = [{transform_indices = @transform_0, window_bounds = array<i64: 8, 1>}, {transform_indices = @transform_1, window_bounds = array<i64: 8, 256>}, {transform_indices = @transform_2, window_bounds = array<i64: 8, 256>}, {transform_indices = @transform_3, window_bounds = array<i64: 8, 256>}, {transform_indices = @transform_4, window_bounds = array<i64: 8, 256>}]} {
    %c0 = arith.constant 0 : index
    %c0_0 = arith.constant 0 : index
    %0 = vector.load %arg2[%c0, %c0_0] : memref<8x1xf32, #tpu.memory_space<vmem>>, vector<8x1xf32>
    %c0_1 = arith.constant 0 : index
    %c0_2 = arith.constant 0 : index
    %1 = vector.load %arg3[%c0_1, %c0_2] : memref<8x256xf32, #tpu.memory_space<vmem>>, vector<8x256xf32>
    %2 = vector.broadcast %0 : vector<8x1xf32> to vector<8x256xf32>
    %3 = arith.mulf %1, %2 : vector<8x256xf32>
    %c0_3 = arith.constant 0 : index
    %c0_4 = arith.constant 0 : index
    %4 = vector.load %arg5[%c0_3, %c0_4] : memref<8x256xf32, #tpu.memory_space<vmem>>, vector<8x256xf32>
    tpu.vector_store %arg5[%c0_3, %c0_4], %3 {strides = array<i32>} : memref<8x256xf32, #tpu.memory_space<vmem>>, vector<8x256xf32>,
    %c0_5 = arith.constant 0 : index
    %c0_6 = arith.constant 0 : index
    %5 = vector.load %arg4[%c0_5, %c0_6] : memref<8x256xf32, #tpu.memory_space<vmem>>, vector<8x256xf32>
    %6 = vector.broadcast %0 : vector<8x1xf32> to vector<8x256xf32>
    %7 = arith.mulf %5, %6 : vector<8x256xf32>
    %c0_7 = arith.constant 0 : index
    %c0_8 = arith.constant 0 : index
    %8 = vector.load %arg6[%c0_7, %c0_8] : memref<8x256xf32, #tpu.memory_space<vmem>>, vector<8x256xf32>
    tpu.vector_store %arg6[%c0_7, %c0_8], %7 {strides = array<i32>} : memref<8x256xf32, #tpu.memory_space<vmem>>, vector<8x256xf32>,
    return
  }
  func.func @transform_0(%arg0: i32, %arg1: i32) -> (i32, i32) {
    %c0_i32 = arith.constant 0 : i32
    %c0_i32_0 = arith.constant 0 : i32
    return %arg0, %c0_i32 : i32, i32
  }
  func.func @transform_1(%arg0: i32, %arg1: i32) -> (i32, i32) {
    %c0_i32 = arith.constant 0 : i32
    return %arg0, %arg1 : i32, i32
  }
  func.func @transform_2(%arg0: i32, %arg1: i32) -> (i32, i32) {
    %c0_i32 = arith.constant 0 : i32
    return %arg0, %arg1 : i32, i32
  }
  func.func @transform_3(%arg0: i32, %arg1: i32) -> (i32, i32) {
    %c0_i32 = arith.constant 0 : i32
    return %arg0, %arg1 : i32, i32
  }
  func.func @transform_4(%arg0: i32, %arg1: i32) -> (i32, i32) {
    %c0_i32 = arith.constant 0 : i32
    return %arg0, %arg1 : i32, i32
  }
}

</mosaic_0001>

<bundles_post_ra>
// kernel: tpu_custom_call.1
= control target key start
LH: loop header
LB: loop body
LE: loop exit
PB: predicated region body
PF: predicated region fallthrough
CT: control target
= control target key end

     0   :  { %10 = vsyncpa [#allocation3], 0  ;;  %s280_s0 = inlined_call_operand.vmem [shape: f32[8,1], index: 0, kind: input, shape index: {}]   ;;  %s281_s1 = inlined_call_operand.hbm [shape: f32[8,256], index: 1, kind: input, shape index: {}, may-alias: {1,3}]   ;;  %s282_s2 = inlined_call_operand.hbm [shape: f32[8,256], index: 2, kind: input, shape index: {}, may-alias: {2,4}]   ;;  %s283_s3 = inlined_call_operand.hbm [shape: f32[8,256], index: 3, kind: output, shape index: {0}, may-alias: {1,3}]   ;;  %s284_s4 = inlined_call_operand.hbm [shape: f32[8,256], index: 4, kind: output, shape index: {1}, may-alias: {2,4}]  }
   0x1   :  { %11 = vsyncpa [#allocation6], 0 }
   0x2   :  { %12 = vsyncpa [#allocation4], 0 }
   0x3   :  { %13 = vsyncpa [#allocation9], 0  ;;  %s192_s15 = smov [#allocation2]   ;;  %s193_s17 = smov [#allocation5]  }
   0x4   :  { %s22_s16 = sshll.u32 %s192_s15, 4  ;;  %s32_s18 = sshll.u32 %s193_s17, 4  ;;  %s23_s16 = int_to_ptr.vmem [resolvable:$true] %s22_s16  ;;  %s33_s18 = int_to_ptr.vmem [resolvable:$true] %s32_s18 }
   0x5   :  { %s96_s21 = scalar_lea.hbm %s281_s1, 256 }
   0x6   :  { %p97_p0 = scmp.ne.s32.totalorder %s281_s1, %s96_s21  ;;  %p100_p1 = scmp.lt.u32.totalorder %s96_s21, %s281_s1 }
   0x8   :  { %p102_p2 = pnand %p100_p1, %p97_p0 }
   0xa   :  { %105 = shalt.err (!%p102_p2)
}
   0xb   :  { %s106_s26 = scalar_lea.vmem %s23_s16, 256  ;;  %p111_p4 = scmp.lt.s32.totalorder %s23_s16, %s23_s16 }
   0xc   :  { %p107_p3 = scmp.ne.s32.totalorder %s23_s16, %s106_s26  ;;  %p112_p5 = scmp.lt.s32.totalorder %s106_s26, %s106_s26 }
   0xe   :  { %p113_p6 = por %p112_p5, %p111_p4 }
  0x10   :  { %p114_p7 = pnand %p113_p6, %p107_p3 }
  0x12   :  { %117 = shalt.err (!%p114_p7)
}
  0x13   :  { %25 = dma.hbm_to_vmem [thread:$0]  %s281_s1, 256, %s23_s16, [#allocation3]  }
  0x14   :  { %s118_s5 = scalar_lea.hbm %s282_s2, 256 }
  0x15   :  { %p119_p8 = scmp.ne.s32.totalorder %s282_s2, %s118_s5  ;;  %p122_p9 = scmp.lt.u32.totalorder %s118_s5, %s282_s2 }
  0x17   :  { %p124_p10 = pnand %p122_p9, %p119_p8 }
  0x19   :  { %127 = shalt.err (!%p124_p10)
}
  0x1a   :  { %s128_s10 = scalar_lea.vmem %s33_s18, 256  ;;  %p133_p12 = scmp.lt.s32.totalorder %s33_s18, %s33_s18 }
  0x1b   :  { %p129_p11 = scmp.ne.s32.totalorder %s33_s18, %s128_s10  ;;  %p134_p13 = scmp.lt.s32.totalorder %s128_s10, %s128_s10 }
  0x1d   :  { %p135_p0 = por %p134_p13, %p133_p12 }
  0x1f   :  { %p136_p1 = pnand %p135_p0, %p129_p11 }
  0x21   :  { %139 = shalt.err (!%p136_p1)
}
  0x22   :  { %35 = dma.hbm_to_vmem [thread:$0]  %s282_s2, 256, %s33_s18, [#allocation6]  }
  0x23   :  { %184 = dma.done.wait [#allocation3], 256  }
  0x24   :  { %185 = vsyncadd [#allocation3], 4294967040 }
  0x25   :  { %186 = dma.done.wait [#allocation6], 256  }
  0x26   :  { %187 = vsyncadd [#allocation6], 4294967040  ;;  %v194_v0 = vmov 0   ;;  %v42_v1 = vld [vmem:[%s280_s0] sm:$0xff]  ;;  %v44_v3 = vld [vmem:[#allocation2 + $0x8] sm:$0xff]  ;;  %s195_s14 = smov [#allocation7]  }
  0x27   :  { %95 = vset.pattern.permute.xlu0 %v194_v0  ;;  %v43_v2 = vld [vmem:[#allocation2] sm:$0xff]  ;;  %v54_v4 = vld [vmem:[#allocation5] sm:$0xff]  ;;  %v55_v5 = vld [vmem:[#allocation5 + $0x8] sm:$0xff]  ;;  %s66_s15 = sshll.u32 %s195_s14, 4  ;;  %s196_s16 = smov [#allocation8]   ;;  %s67_s15 = int_to_ptr.vmem [resolvable:$true] %s66_s15 }
  0x28   :  { %47 = vperm.xlu0 %95, %v42_v1   ;;  %s76_s17 = sshll.u32 %s196_s16, 4  ;;  %s140_s0 = scalar_lea.vmem %s67_s15, 256  ;;  %s249_s17 = int_to_ptr.vmem [resolvable:$true] %s76_s17 }
  0x29   :  { %p141_p2 = scmp.ne.s32.totalorder %s67_s15, %s140_s0  ;;  %p145_p3 = scmp.lt.s32.totalorder %s67_s15, %s67_s15 }
  0x2a   :  { %p146_p4 = scmp.lt.s32.totalorder %s140_s0, %s140_s0 }
  0x2c   :  { %p147_p5 = por %p146_p4, %p145_p3 }
  0x2e   :  { %p148_p6 = pnand %p147_p5, %p141_p2 }
  0xa7   :  { %v48_v6 = vpop.permute.xlu0 %47 }
  0xa8   :  { %v50_v7 = vmul.f32 %v48_v6, %v43_v2  ;;  %v51_v8 = vmul.f32 %v48_v6, %v44_v3  ;;  %v56_v9 = vmul.f32 %v54_v4, %v48_v6  ;;  %v57_v10 = vmul.f32 %v55_v5, %v48_v6 }
  0xaa   :  { %52 = vst [vmem:[#allocation7] sm:$0xff] %v50_v7  ;;  %53 = vst [vmem:[#allocation7 + $0x8] sm:$0xff] %v51_v8 }
  0xab   :  { %58 = vst [vmem:[#allocation8] sm:$0xff] %v56_v9  ;;  %59 = vst [vmem:[#allocation8 + $0x8] sm:$0xff] %v57_v10 }
  0xac   :  { %151 = shalt.err (!%p148_p6)
}
  0xad   :  { %s152_s19 = scalar_lea.hbm %s283_s3, 256 }
  0xae   :  { %p153_p7 = scmp.ne.s32.totalorder %s283_s3, %s152_s19  ;;  %p156_p8 = scmp.lt.u32.totalorder %s152_s19, %s283_s3 }
  0xb0   :  { %p158_p9 = pnand %p156_p8, %p153_p7 }
  0xb2   :  { %161 = shalt.err (!%p158_p9)
}
  0xb3   :  { %69 = dma.vmem_to_hbm [thread:$0]  %s67_s15, 256, %s283_s3, [#allocation4]  }
  0xb4   :  { %s162_s26 = scalar_lea.vmem %s249_s17, 256  ;;  %p167_p11 = scmp.lt.s32.totalorder %s249_s17, %s249_s17 }
  0xb5   :  { %p163_p10 = scmp.ne.s32.totalorder %s249_s17, %s162_s26  ;;  %p168_p12 = scmp.lt.s32.totalorder %s162_s26, %s162_s26 }
  0xb7   :  { %p169_p13 = por %p168_p12, %p167_p11 }
  0xb9   :  { %p170_p0 = pnand %p169_p13, %p163_p10 }
  0xbb   :  { %173 = shalt.err (!%p170_p0)
}
  0xbc   :  { %s174_s29 = scalar_lea.hbm %s284_s4, 256 }
  0xbd   :  { %p175_p1 = scmp.ne.s32.totalorder %s284_s4, %s174_s29  ;;  %p178_p2 = scmp.lt.u32.totalorder %s174_s29, %s284_s4 }
  0xbf   :  { %p180_p3 = pnand %p178_p2, %p175_p1 }
  0xc1   :  { %183 = shalt.err (!%p180_p3)
}
  0xc2   :  { %79 = dma.vmem_to_hbm [thread:$0]  %s249_s17, 256, %s284_s4, [#allocation9]  }
  0xc3   :  { %188 = dma.done.wait [#allocation4], 256  }
  0xc4   :  { %189 = vsyncadd [#allocation4], 4294967040 }
  0xc5   :  { %190 = dma.done.wait [#allocation9], 256  }
  0xc6   :  { %191 = vsyncadd [#allocation9], 4294967040 }
  0xc7   :  { %86 = vsyncpa [#allocation3], 1 }
  0xc8   :  { %87 = vsyncpa [#allocation6], 1 }
  0xc9   :  { %88 = vsyncpa [#allocation4], 1 }
  0xca   :  { %89 = vsyncpa [#allocation9], 1 }

</bundles_post_ra>
